<compile_context>
chip_gen: v7x
topology: tpu7x:2x2x1
jax: 0.10.0
libtpu: 0.0.40
codegen_flags: <defaults>
</compile_context>

<pallas_src>
import functools

import jax
import jax.numpy as jnp
from jax.experimental import pallas as pl
from jax.experimental.pallas import tpu as pltpu


def _layernorm_kernel(x_ref, g_ref, b_ref, o_ref, *, eps, feat):
    x = x_ref[...].astype(jnp.float32)        # (block_rows, feat)
    gamma = g_ref[...].astype(jnp.float32)    # (1, feat)
    beta = b_ref[...].astype(jnp.float32)     # (1, feat)

    # Mean over the real (logical) feature axis; Mosaic masks any physical
    # lane padding out of the reduction, so no explicit mask is needed.
    mean = jnp.sum(x, axis=-1, keepdims=True) * (1.0 / feat)
    centered = x - mean

    # torch.std default: unbiased (divide by N-1). feat==1 is guarded so the
    # kernel stays finite (torch would return NaN there) — intentional.
    inv_denom = 1.0 / max(feat - 1, 1)
    var = jnp.sum(centered * centered, axis=-1, keepdims=True) * inv_denom
    std = jnp.sqrt(var)

    # Per-row reciprocal on the EUP (own VLIW slot) + one Newton-Raphson step
    # for ~full f32 accuracy; replaces a per-element VPU divide with cheap
    # broadcast multiplies.
    d = std + eps
    r = pl.reciprocal(d, approx=True)
    inv = r * (2.0 - d * r)

    o_ref[...] = ((centered * inv) * gamma + beta).astype(o_ref.dtype)


def layer_norm(x, gamma, beta, *, eps=1e-6, block_rows=None):
    """x: (..., features). gamma/beta: (features,)."""
    orig_shape = x.shape
    feat = orig_shape[-1]
    x2 = x.reshape(-1, feat)
    rows = x2.shape[0]
    g2 = gamma.reshape(1, feat)
    b2 = beta.reshape(1, feat)

    itemsize = jnp.dtype(x.dtype).itemsize
    # Physical lane footprint used only for byte sizing (no data is padded).
    feat_p = ((feat + 127) // 128) * 128

    # Generation-aware VMEM budget.
    try:
        vmem_cap = int(pltpu.get_tpu_info().vmem_capacity_bytes)
    except Exception:
        vmem_cap = 64 << 20  # conservative (v7x-sized) fallback
    if vmem_cap >= (100 << 20):        # v5e / v6e: 128 MiB per core
        target_bytes = 8 << 20
        vmem_limit_cap = 96 << 20
    else:                              # v7x: 64 MiB per TensorCore
        target_bytes = 4 << 20
        vmem_limit_cap = 56 << 20

    if block_rows is None:
        # Byte-capped row tile, multiple of 8 sublanes, no hard row cap.
        block_rows = target_bytes // max(feat_p * itemsize, 1)
        block_rows = max(8, (block_rows // 8) * 8)
        rows_8 = ((rows + 7) // 8) * 8
        block_rows = max(8, min(block_rows, rows_8))
        block_rows = max(8, (block_rows // 8) * 8)
        # Aim for >= 8 grid steps total (>= ~4 per v7x TensorCore) so the
        # software pipeline can hide VPU/XLU work behind the HBM stream.
        while block_rows > 8 and -(-rows // block_rows) < 8:
            block_rows = max(8, ((block_rows // 2) // 8) * 8)
    block_rows = int(block_rows)

    # VMEM budget: double-buffered in/out tiles + in-body f32 temporaries
    # (x, centered, products, upcast output) + gamma/beta + slack.
    io_bufs = 2 * 2 * block_rows * feat_p * itemsize
    f32_tmp = 4 * block_rows * feat_p * 4
    params = 2 * 2 * feat_p * jnp.dtype(gamma.dtype).itemsize
    needed = io_bufs + f32_tmp + params + (4 << 20)
    vmem_limit = int(min(max(needed, 32 << 20), vmem_limit_cap))

    kernel = functools.partial(_layernorm_kernel, eps=eps, feat=feat)

    out = pl.pallas_call(
        kernel,
        out_shape=jax.ShapeDtypeStruct((rows, feat), x.dtype),
        grid_spec=pltpu.PrefetchScalarGridSpec(
            num_scalar_prefetch=0,
            grid=(pl.cdiv(rows, block_rows),),
            in_specs=[
                pl.BlockSpec((block_rows, feat), lambda i: (i, 0)),
                pl.BlockSpec((1, feat), lambda i: (0, 0)),
                pl.BlockSpec((1, feat), lambda i: (0, 0)),
            ],
            out_specs=pl.BlockSpec((block_rows, feat), lambda i: (i, 0)),
        ),
        compiler_params=pltpu.CompilerParams(
            dimension_semantics=("parallel",),
            vmem_limit_bytes=vmem_limit),
        cost_estimate=pl.CostEstimate(
            flops=int(5 * rows * feat),
            transcendentals=int(2 * rows),
            bytes_accessed=int(2 * rows * feat * itemsize + 2 * feat * itemsize)),
    )(x2, g2, b2)

    return out.reshape(orig_shape)


if __name__ == "__main__":
    key = jax.random.PRNGKey(0)
    batch, seq, hidden = 2, 8, 32
    x = jax.random.normal(key, (batch, seq, hidden), dtype=jnp.float32)

    # Deterministic parameter init matching nn.Parameter(torch.ones/zeros).
    gamma = jnp.ones((hidden,), dtype=jnp.float32)
    beta = jnp.zeros((hidden,), dtype=jnp.float32)

    out = layer_norm(x, gamma, beta, eps=1e-6)
    out = jax.block_until_ready(out)

    # Reference check in plain JAX (unbiased std, eps added to std).
    mean = jnp.mean(x, axis=-1, keepdims=True)
    std = jnp.sqrt(jnp.sum((x - mean) ** 2, axis=-1, keepdims=True) / (hidden - 1))
    ref = gamma * (x - mean) / (std + 1e-6) + beta
    assert jnp.allclose(out, ref, atol=1e-5, rtol=1e-5), "mismatch vs reference"

    print("KERNEL_OK")
</pallas_src>

<mosaic_0001>
module attributes {stable_mosaic.version = 11 : i64} {
  func.func @_layernorm_kernel(%arg0: i32, %arg1: memref<8x32xf32, #tpu.memory_space<vmem>>, %arg2: memref<1x32xf32, #tpu.memory_space<vmem>>, %arg3: memref<1x32xf32, #tpu.memory_space<vmem>>, %arg4: memref<8x32xf32, #tpu.memory_space<vmem>>) attributes {dimension_semantics = [#tpu.dimension_semantics<parallel>], iteration_bounds = array<i64: 2>, scalar_prefetch = 0 : i64, scratch_operands = 0 : i64, tpu.core_type = #tpu.core_type<tc>, window_params = [{transform_indices = @transform_0, window_bounds = array<i64: 8, 32>}, {pipeline_mode = #tpu.pipeline_mode<synchronous>, transform_indices = @transform_1, window_bounds = array<i64: 1, 32>}, {pipeline_mode = #tpu.pipeline_mode<synchronous>, transform_indices = @transform_2, window_bounds = array<i64: 1, 32>}, {transform_indices = @transform_3, window_bounds = array<i64: 8, 32>}]} {
    %c0 = arith.constant 0 : index
    %c0_0 = arith.constant 0 : index
    %0 = vector.load %arg1[%c0, %c0_0] : memref<8x32xf32, #tpu.memory_space<vmem>>, vector<8x32xf32>
    %c0_1 = arith.constant 0 : index
    %c0_2 = arith.constant 0 : index
    %1 = vector.load %arg2[%c0_1, %c0_2] : memref<1x32xf32, #tpu.memory_space<vmem>>, vector<1x32xf32>
    %c0_3 = arith.constant 0 : index
    %c0_4 = arith.constant 0 : index
    %2 = vector.load %arg3[%c0_3, %c0_4] : memref<1x32xf32, #tpu.memory_space<vmem>>, vector<1x32xf32>
    %cst = arith.constant dense<0.000000e+00> : vector<8xf32>
    %3 = vector.multi_reduction <add>, %0, %cst [1] : vector<8x32xf32> to vector<8xf32>
    %4 = vector.shape_cast %3 : vector<8xf32> to vector<8x1xf32>
    %cst_5 = arith.constant 3.125000e-02 : f32
    %5 = vector.broadcast %cst_5 : f32 to vector<8x1xf32>
    %6 = arith.mulf %4, %5 : vector<8x1xf32>
    %7 = vector.broadcast %6 : vector<8x1xf32> to vector<8x32xf32>
    %8 = arith.subf %0, %7 : vector<8x32xf32>
    %9 = arith.mulf %8, %8 : vector<8x32xf32>
    %cst_6 = arith.constant dense<0.000000e+00> : vector<8xf32>
    %10 = vector.multi_reduction <add>, %9, %cst_6 [1] : vector<8x32xf32> to vector<8xf32>
    %11 = vector.shape_cast %10 : vector<8xf32> to vector<8x1xf32>
    %cst_7 = arith.constant 0.0322580636 : f32
    %12 = vector.broadcast %cst_7 : f32 to vector<8x1xf32>
    %13 = arith.mulf %11, %12 : vector<8x1xf32>
    %14 = math.sqrt %13 : vector<8x1xf32>
    %cst_8 = arith.constant 9.99999997E-7 : f32
    %15 = vector.broadcast %cst_8 : f32 to vector<8x1xf32>
    %16 = arith.addf %14, %15 : vector<8x1xf32>
    %17 = tpu.reciprocal %16 {approx = true} : vector<8x1xf32> -> vector<8x1xf32>
    %18 = arith.mulf %16, %17 : vector<8x1xf32>
    %cst_9 = arith.constant 2.000000e+00 : f32
    %19 = vector.broadcast %cst_9 : f32 to vector<8x1xf32>
    %20 = arith.subf %19, %18 : vector<8x1xf32>
    %21 = arith.mulf %17, %20 : vector<8x1xf32>
    %22 = vector.broadcast %21 : vector<8x1xf32> to vector<8x32xf32>
    %23 = arith.mulf %8, %22 : vector<8x32xf32>
    %24 = vector.broadcast %1 : vector<1x32xf32> to vector<8x32xf32>
    %25 = arith.mulf %23, %24 : vector<8x32xf32>
    %26 = vector.broadcast %2 : vector<1x32xf32> to vector<8x32xf32>
    %27 = arith.addf %25, %26 : vector<8x32xf32>
    %c0_10 = arith.constant 0 : index
    %c0_11 = arith.constant 0 : index
    %28 = vector.load %arg4[%c0_10, %c0_11] : memref<8x32xf32, #tpu.memory_space<vmem>>, vector<8x32xf32>
    tpu.vector_store %arg4[%c0_10, %c0_11], %27 {strides = array<i32>} : memref<8x32xf32, #tpu.memory_space<vmem>>, vector<8x32xf32>,
    return
  }
  func.func @transform_0(%arg0: i32) -> (i32, i32) {
    %c0_i32 = arith.constant 0 : i32
    %c0_i32_0 = arith.constant 0 : i32
    return %arg0, %c0_i32 : i32, i32
  }
  func.func @transform_1(%arg0: i32) -> (i32, i32) {
    %c0_i32 = arith.constant 0 : i32
    %c0_i32_0 = arith.constant 0 : i32
    %c0_i32_1 = arith.constant 0 : i32
    return %c0_i32, %c0_i32_0 : i32, i32
  }
  func.func @transform_2(%arg0: i32) -> (i32, i32) {
    %c0_i32 = arith.constant 0 : i32
    %c0_i32_0 = arith.constant 0 : i32
    %c0_i32_1 = arith.constant 0 : i32
    return %c0_i32, %c0_i32_0 : i32, i32
  }
  func.func @transform_3(%arg0: i32) -> (i32, i32) {
    %c0_i32 = arith.constant 0 : i32
    %c0_i32_0 = arith.constant 0 : i32
    return %arg0, %c0_i32 : i32, i32
  }
}

</mosaic_0001>

<bundles_post_ra>
// kernel: tpu_custom_call.1
= control target key start
LH: loop header
LB: loop body
LE: loop exit
PB: predicated region body
PF: predicated region fallthrough
CT: control target
= control target key end

     0   :  { %8 = vsyncpa [#allocation3], 0  ;;  %s670_s0 = inlined_call_operand.hbm [shape: f32[16,32], index: 0, kind: input, shape index: {}]   ;;  %s671_s1 = inlined_call_operand.vmem [shape: f32[1,32], index: 1, kind: input, shape index: {}]   ;;  %s672_s2 = inlined_call_operand.vmem [shape: f32[1,32], index: 2, kind: input, shape index: {}]   ;;  %s673_s3 = inlined_call_operand.hbm [shape: f32[16,32], index: 3, kind: output, shape index: {}]  }
   0x1   :  { %10 = vsyncpa [#allocation3 + $0x1], 0 }
   0x2   :  { %11 = vsyncpa [#allocation4], 0 }
   0x3   :  { %13 = vsyncpa [#allocation4 + $0x1], 0  ;;  %s496_s12 = smov 0   ;;  %s498_s13 = smov 0  }
   0x4   :  { %s500_s14 = smov 0   ;;  %s502_s15 = smov 0  }
   0x5 LB: > { %s517_s16 = sadd.s32 4294967295, %s472_s15   ;;  %s312_s17 = sadd.s32 4294967294, %s472_s15   ;;  %s472_s15 = sphi %s502_s15, %s688_s15   ;;  %s468_s14 = sphi %s500_s14, %s687_s14   ;;  %s464_s13 = sphi %s498_s13, %s686_s13   ;;  %s460_s12 = sphi %s496_s12, %s685_s12  }
   0x6   : > { %s521_s18 = sadd.s32 1, %s472_s15   ;;  %s26_s19 = sadd.s32 1, %s468_s14 }
   0x7   : > { %s23_s20 = ssub.s32 %s472_s15, %s521_s18  ;;  %p33_p0 = scmp.ne.s32.totalorder %s468_s14, %s464_s13 }
   0x8   : > { %p24_p1 = scmp.eq.s32.totalorder %s23_s20, 0  ;;  %p34_p2 = scmp.eq.s32.totalorder %s472_s15, 0 }
   0x9   : > { %p39_p3 = scmp.ne.s32.totalorder %s464_s13, %s460_s12  ;;  %p40_p4 = scmp.eq.s32.totalorder %s517_s16, 0 }
   0xa   : > { %s533_s21 = scalar_select %p24_p1, %s468_s14, %s26_s19  }
   0xb   : > { %p535_p5 = por %p34_p2, %p33_p0  ;;  %p539_p6 = por %p40_p4, %p39_p3 }
   0xc   : > { %p105_p7 = scmp.eq.s32.totalorder %s517_s16, 1  ;;  %p111_p8 = scmp.eq.s32.totalorder %s312_s17, 1 }
   0xd   : > { %p338_p10 = scmp.lt.s32.totalorder %s472_s15, 2  ;;  %s137_s26 = sand.u32 1, %s468_s14  }
   0xe   : > { %p546_p11 = por %p105_p7, %p33_p0  ;;  %p550_p12 = por %p111_p8, %p39_p3 }
   0xf   : > { %s316_s27 = sshll.u32 %s472_s15, 7  ;;  %s315_s28 = sshll.u32 %s137_s26, 3 }
  0x10   : > { %s677_s24 = scalar_select %p546_p11, 1, 0 }
  0x11   : > { %s678_s25 = scalar_select %p550_p12, 1, 0 }
  0x12   : > { %s559_s4 = scalar_lea.hbm %s670_s0, %s316_s27  ;;  %s141_s5 = scalar_lea.vmem [#allocation2], %s315_s28 }
  0x13   : > { %s148_s6 = sshll.u32 %s141_s5, 4  ;;  %p563_p13 = pnand %p338_p10, %p535_p5  ;;  %s567_s6 = int_to_ptr.vmem [resolvable:$true] %s148_s6 }
  0x14   : > { %s138_s8 = scalar_lea.sflag [#allocation3], %s137_s26  ;;  %s376_s9 = scalar_lea.hbm %s559_s4, 128 }
  0x15   : > { %p377_p2 = scmp.ne.s32.totalorder %s559_s4, %s376_s9  ;;  %p378_p3 = pneg %p563_p13 }
  0x16   : > { %s381_s17 = scalar_lea.hbm %s670_s0, 256  ;;  %p382_p5 = scmp.lt.u32.totalorder %s559_s4, %s670_s0 }
  0x17   : > { %p379_p4 = pnand %p378_p3, %p377_p2  ;;  %p383_p8 = scmp.lt.u32.totalorder %s381_s17, %s376_s9 }
  0x18   : > { %p385_p9 = scmp.lt.u32.totalorder %s376_s9, %s559_s4 }
  0x19   : > { %p380_p7 = pneg %p379_p4  ;;  %p384_p10 = por %p383_p8, %p382_p5 }
  0x1b   : > { %p386_p0 = por %p385_p9, %p384_p10 }
  0x1d   : > { %p387_p1 = pnand %p386_p0, %p380_p7 }
  0x1f   : > { %390 = shalt.err (!%p387_p1)
}
  0x20   : > { %s391_s22 = scalar_lea.vmem %s567_s6, 128  ;;  %s474_s26 = smov [#allocation2]  }
  0x21   : > { %p392_p2 = scmp.ne.s32.totalorder %s567_s6, %s391_s22  ;;  %s396_s27 = sshll.u32 %s474_s26, 4  ;;  %s397_s27 = int_to_ptr.vmem [resolvable:$false] %s396_s27 }
  0x22   : > { %s398_s28 = scalar_lea.vmem %s397_s27, 256  ;;  %p399_p11 = scmp.lt.s32.totalorder %s567_s6, %s397_s27 }
  0x23   : > { %p394_p4 = pnand %p392_p2, %p378_p3  ;;  %p400_p5 = scmp.lt.s32.totalorder %s398_s28, %s391_s22 }
  0x25   : > { %p395_p12 = pneg %p394_p4  ;;  %p401_p8 = por %p400_p5, %p399_p11 }
  0x27   : > { %p402_p9 = pnand %p401_p8, %p395_p12 }
  0x29   : > { %405 = shalt.err (!%p402_p9)
}
  0x2a   : > { %333 = dma.hbm_to_vmem [thread:$0]  (!%p563_p13), %s559_s4, 128, %s567_s6, %s138_s8  }
  0x2b   : > { %p680_p0 = scmp.lt.s32.totalorder %s472_s15, 3  ;;  %p681_p1 = scmp.ge.s32.totalorder %s472_s15, 1 }
  0x2d   : > { %p154_p3 = pnand %p681_p1, %p680_p0 }
  0x2e   : > { %s601_s29 = sand.u32 (!%p154_p3), 1, %s464_s13  }
  0x2f   : > { %157 = sbr.rel (%p154_p3) target bundleno = 404 (0x194), region = 32  ;;  %s318_s30 = sshll.u32 (!%p154_p3), %s601_s29, 3 }
  0x30   : > { %s160_s5 = scalar_lea.sflag (!%p154_p3), [#allocation3], %s601_s29  ;;  %s163_s7 = scalar_lea.vmem (!%p154_p3), [#allocation2], %s318_s30 }
  0x36   : > { %451 = dma.done.wait (%p539_p6), %s160_s5, 128  }
  0x37   : > { %453 = vsyncadd (%p539_p6), %s160_s5, 4294967168  ;;  %vm189_vm0 = vcmask 261120   ;;  %v186_v0 = vld [vmem:[%s163_s7] sm:$0xff]  ;;  %s323_s9 = sshll.u32 %s517_s16, 7  ;;  %s185_s10 = scalar_lea.vmem [#allocation5], %s318_s30 }
  0x38   : > { %v190_v1 = vsel %vm189_vm0, %v186_v0, 0.0  ;;  %v320_v19 = vld [vmem:[%s671_s1] ss:$0 sm:$0xff]  ;;  %s242_s11 = sshll.u32 %s185_s10, 4  ;;  %s625_s20 = scalar_lea.hbm %s673_s3, %s323_s9  ;;  %s627_s11 = int_to_ptr.vmem [resolvable:$true] %s242_s11 }
  0x39   : > { %191 = vadd.xlane.f32.xlu0 %v190_v1  ;;  %v321_v21 = vld [vmem:[%s672_s2] ss:$0 sm:$0xff]  ;;  %s229_s22 = scalar_lea.sflag [#allocation4], %s601_s29  ;;  %s406_s26 = scalar_lea.vmem %s627_s11, 128 }
  0x3a   : > { %p407_p6 = scmp.ne.s32.totalorder %s627_s11, %s406_s26  ;;  %p682_p11 = scmp.ne.s32.totalorder %s677_s24, 0 }
  0x3b   : > { %s475_s16 = smov [#allocation5]  }
  0x3c   : > { %p408_p12 = pnand %p407_p6, %p682_p11  ;;  %s410_s27 = sshll.u32 %s475_s16, 4  ;;  %s411_s27 = int_to_ptr.vmem [resolvable:$false] %s410_s27 }
  0x3d   : > { %s412_s28 = scalar_lea.vmem %s411_s27, 256  ;;  %p413_p7 = scmp.lt.s32.totalorder %s627_s11, %s411_s27 }
  0x3e   : > { %p409_p13 = pneg %p408_p12  ;;  %p414_p10 = scmp.lt.s32.totalorder %s412_s28, %s406_s26 }
  0x40   : > { %p415_p2 = por %p414_p10, %p413_p7 }
  0x42   : > { %p416_p4 = pnand %p415_p2, %p409_p13 }
  0xc6   : > { %v192_v2 = vpop.xlane.xlu0 %191 }
  0xc7   : > { %v193_v3 = vmul.f32 0.03125, %v192_v2 }
  0xc9   : > { %v194_v4 = vsub.f32 %v186_v0, %v193_v3 }
  0xcb   : > { %v195_v5 = vmul.f32 %v194_v4, %v194_v4 }
  0xcd   : > { %v196_v6 = vsel %vm189_vm0, %v195_v5, 0.0 }
  0xce   : > { %197 = vadd.xlane.f32.xlu0 %v196_v6 }
 0x15b   : > { %v198_v7 = vpop.xlane.xlu0 %197 }
 0x15c   : > { %v199_v8 = vmul.f32 0.032258064, %v198_v7 }
 0x15e   : > { %372 = vrsqrt.f32 %v199_v8  ;;  %vm202_vm1 = vcmp.eq.f32.partialorder %v199_v8, inf  ;;  %v205_v11 = vand.u32 2147483648, %v199_v8  ;;  %vm204_vm2 = vcmp.eq.f32.partialorder %v199_v8, 0.0 }
 0x168   : > { %v373_v9 = vpop.eup %372 }
 0x169   : > { %v201_v10 = vmul.f32 %v373_v9, %v199_v8 }
 0x16b   : > { %v203_v12 = vsel %vm202_vm1, %v199_v8, %v201_v10 }
 0x16c   : > { %v206_v13 = vsel %vm204_vm2, %v205_v11, %v203_v12 }
 0x16d   : > { %v207_v14 = vadd.f32 1e-06, %v206_v13 }
 0x16f   : > { %374 = vrcp.f32 %v207_v14 }
 0x179   : > { %v375_v15 = vpop.eup %374 }
 0x17a   : > { %v209_v16 = vmul.f32 %v375_v15, %v207_v14 }
 0x17c   : > { %v210_v17 = vsub.f32 2.0, %v209_v16 }
 0x17e   : > { %v211_v18 = vmul.f32 %v375_v15, %v210_v17 }
 0x180   : > { %v212_v20 = vmul.f32 %v211_v18, %v194_v4 }
 0x182   : > { %v219_v22 = vmul.f32 %v320_v19, %v212_v20 }
 0x184   : > { %v226_v23 = vadd.f32 %v321_v21, %v219_v22 }
 0x186   : > { %227 = vst.msk [vmem:[%s185_s10] sm:$0xff] %vm189_vm0, %v226_v23 }
 0x187   : > { %419 = shalt.err (!%p416_p4)
}
 0x188   : > { %s420_s29 = scalar_lea.hbm %s625_s20, 128  ;;  %s424_s7 = scalar_lea.hbm %s673_s3, 256 }
 0x189   : > { %p421_p5 = scmp.ne.s32.totalorder %s625_s20, %s420_s29  ;;  %p425_p0 = scmp.lt.u32.totalorder %s625_s20, %s673_s3 }
 0x18a   : > { %p426_p1 = scmp.lt.u32.totalorder %s424_s7, %s420_s29  ;;  %p428_p6 = scmp.lt.u32.totalorder %s420_s29, %s625_s20 }
 0x18b   : > { %p422_p8 = pnand %p421_p5, %p682_p11 }
 0x18c   : > { %p427_p3 = por %p426_p1, %p425_p0 }
 0x18d   : > { %p423_p9 = pneg %p422_p8 }
 0x18e   : > { %p429_p12 = por %p428_p6, %p427_p3 }
 0x190   : > { %p430_p13 = pnand %p429_p12, %p423_p9 }
 0x192   : > { %433 = shalt.err (!%p430_p13)
}
 0x193   : > { %328 = dma.vmem_to_hbm [thread:$0]  (%p682_p11), %s627_s11, 128, %s625_s20, %s229_s22  }
 0x194 PF: > { %s254_s6 = sand.u32 1, %s460_s12   ;;  %p683_p7 = scmp.ne.s32.totalorder %s678_s25, 0 }
 0x195   : > { %p684_p10 = scmp.ge.s32.totalorder %s472_s15, 2  ;;  %s255_s8 = scalar_lea.sflag [#allocation4], %s254_s6 }
 0x197   : > { %p335_p2 = pnand %p684_p10, %p683_p7 }
 0x199   : > { %455 = dma.done.wait (!%p335_p2), %s255_s8, 128  }
 0x19a   : > { %457 = vsyncadd (!%p335_p2), %s255_s8, 4294967168  ;;  %p16_p4 = scmp.ge.s32.totalorder %s521_s18, 4   ;;  %s685_s12 = smov %s464_s13 }
 0x19b   : > { %s686_s13 = smov %s468_s14  ;;  %s687_s14 = smov %s533_s21 }
 0x19c   : > { %s688_s15 = smov %s521_s18  ;;  %18 = sbr.rel (!%p16_p4) target bundleno = 5 (0x5), region = 77 }
 0x1a3   :  { %260 = vsyncpa [#allocation3], 1 }
 0x1a4   :  { %262 = vsyncpa [#allocation3 + $0x1], 1 }
 0x1a5   :  { %263 = vsyncpa [#allocation4], 1 }
 0x1a6   :  { %265 = vsyncpa [#allocation4 + $0x1], 1 }

</bundles_post_ra>
